<compile_context>
chip_gen: v7x
topology: tpu7x:2x2x1
jax: 0.10.0
libtpu: 0.0.40
codegen_flags: <defaults>
</compile_context>

<pallas_src>
import math
import functools

import jax
import jax.numpy as jnp
from jax import lax
from jax.experimental import pallas as pl
from jax.experimental.pallas import tpu as pltpu


def _mha_fused_kernel(kx_ref, vx_ref, qx_ref,
                      wk_ref, bk_ref, wv_ref, bv_ref, wq_ref, bq_ref,
                      wf_ref, bf_ref, gamma_ref, beta_ref,
                      o_ref, *, num_heads, seq_len, scale, eps):
    # Whole-array VMEM blocks (no grid): read each ref exactly once.
    kx = kx_ref[...].astype(jnp.float32)   # (B*L, D)
    vx = vx_ref[...].astype(jnp.float32)   # (B*L, D)
    qx = qx_ref[...].astype(jnp.float32)   # (B*L, D)  -- also the residual

    # x @ W^T without an in-kernel transpose: contract last axes of both.
    contract_last = (((1,), (1,)), ((), ()))

    def proj(x, w_ref, b_ref):
        y = lax.dot_general(x, w_ref[...], contract_last,
                            preferred_element_type=jnp.float32)
        return y + b_ref[...]              # bias (1, Dout) broadcasts over rows

    kp = proj(kx, wk_ref, bk_ref)                  # (B*L, D)
    vp = proj(vx, wv_ref, bv_ref)                  # (B*L, D)
    qp = proj(qx, wq_ref, bq_ref) * scale          # fold score scale into Q once

    BL, D = kp.shape
    H = num_heads
    L = seq_len
    d = D // H
    rows_per_head = L // H                 # rows of the (B*L, D) slab per "view head"
    num_slices = BL // rows_per_head       # == B * H

    def deinterleave(block):
        # (rows_per_head, D) -> (L, d).  Equals the torch .view head tensor up
        # to a fixed row permutation (same permutation for q/k/v -> exact).
        return jnp.concatenate(
            [block[:, c * d:(c + 1) * d] for c in range(H)], axis=0)

    ctx_blocks = []
    for n in range(num_slices):            # B*H = 4: fully unrolled at trace time
        r0 = n * rows_per_head
        q_h = deinterleave(qp[r0:r0 + rows_per_head, :])   # (L, d)
        k_h = deinterleave(kp[r0:r0 + rows_per_head, :])   # (L, d)
        v_h = deinterleave(vp[r0:r0 + rows_per_head, :])   # (L, d)

        # scores (already scaled via qp), softmax, context
        s = lax.dot_general(q_h, k_h, contract_last,
                            preferred_element_type=jnp.float32)       # (L, L)
        s = s - jnp.max(s, axis=-1, keepdims=True)
        p = jnp.exp(s)
        p = p * pl.reciprocal(jnp.sum(p, axis=-1, keepdims=True), approx=True)
        ctx = jnp.dot(p, v_h, preferred_element_type=jnp.float32)     # (L, d)

        # Undo the row permutation: back to the (rows_per_head, D) slab layout
        # (this is exactly torch's context.view(B, -1, d*H) for this slice).
        ctx_blocks.append(jnp.concatenate(
            [ctx[c * rows_per_head:(c + 1) * rows_per_head, :] for c in range(H)],
            axis=1))

    context = jnp.concatenate(ctx_blocks, axis=0)          # (B*L, D)

    # Final projection  (dropout p=0.0 == identity)
    out = lax.dot_general(context, wf_ref[...], contract_last,
                          preferred_element_type=jnp.float32) + bf_ref[...]

    # Residual add + LayerNorm over model_dim (f32 accumulation)
    x = qx + out
    mean = jnp.mean(x, axis=-1, keepdims=True)
    xc = x - mean
    var = jnp.mean(xc * xc, axis=-1, keepdims=True)
    inv = lax.rsqrt(var + eps)
    o_ref[...] = (xc * inv * gamma_ref[...] + beta_ref[...]).astype(o_ref.dtype)


def multi_head_attention(key, value, query, params, num_heads, eps=1e-5):
    B, L, D = query.shape
    assert D % num_heads == 0 and L % num_heads == 0
    d = D // num_heads
    # torch: scale = sqrt(dim_per_head // num_heads); falsy (0) means "no scaling".
    scale = math.sqrt(d // num_heads) or 1.0

    flat = lambda t: jnp.reshape(t, (B * L, D))   # free row-major view

    kern = functools.partial(_mha_fused_kernel, num_heads=num_heads,
                             seq_len=L, scale=scale, eps=eps)
    vmem = lambda: pl.BlockSpec(memory_space=pltpu.MemorySpace.VMEM)

    out = pl.pallas_call(
        kern,
        out_shape=jax.ShapeDtypeStruct((B * L, D), query.dtype),
        in_specs=[vmem() for _ in range(13)],
        out_specs=vmem(),
    )(flat(key), flat(value), flat(query),
      params["wk"], params["bk"], params["wv"], params["bv"],
      params["wq"], params["bq"], params["wf"], params["bf"],
      params["gamma"], params["beta"])
    return jnp.reshape(out, (B, L, D))


# ---------------------------------------------------------------------------
# Pure-JAX reference (mirrors the PyTorch module, incl. the .view head split)
# ---------------------------------------------------------------------------
def _reference(key, value, query, params, num_heads, eps=1e-5):
    B, L, D = query.shape
    d = D // num_heads
    lin = lambda x, w, b: jnp.einsum("bld,od->blo", x, w) + b
    kp = lin(key, params["wk"], params["bk"])
    vp = lin(value, params["wv"], params["bv"])
    qp = lin(query, params["wq"], params["bq"])
    kh = kp.reshape(B * num_heads, -1, d)
    vh = vp.reshape(B * num_heads, -1, d)
    qh = qp.reshape(B * num_heads, -1, d)
    scale = math.sqrt(d // num_heads) or 1.0
    s = jnp.einsum("bqd,bkd->bqk", qh, kh) * scale
    p = jax.nn.softmax(s, axis=-1)
    ctx = jnp.einsum("bqk,bkd->bqd", p, vh).reshape(B, -1, d * num_heads)
    out = jnp.einsum("bld,od->blo", ctx, params["wf"]) + params["bf"]
    x = query + out
    mean = x.mean(-1, keepdims=True)
    var = ((x - mean) ** 2).mean(-1, keepdims=True)
    return (x - mean) / jnp.sqrt(var + eps) * params["gamma"] + params["beta"]


# ---------------------------------------------------------------------------
if __name__ == "__main__":
    # Small shapes consistent with the module: model_dim=32, num_heads=2,
    # batch=2, seq=8 -> dim_per_head=16, scale=sqrt(16//2)=sqrt(8).
    B, L, D, H = 2, 8, 32, 2

    root = jax.random.PRNGKey(0)
    keys = jax.random.split(root, 12)

    key_in = jax.random.normal(keys[0], (B, L, D), jnp.float32)
    value_in = jax.random.normal(keys[1], (B, L, D), jnp.float32)
    query_in = jax.random.normal(keys[2], (B, L, D), jnp.float32)

    def init_linear(kw, kb, dout, din):
        w = jax.random.normal(kw, (dout, din), jnp.float32) * 0.05
        b = jax.random.normal(kb, (1, dout), jnp.float32) * 0.05
        return w, b

    wk, bk = init_linear(keys[3], keys[4], D, D)
    wv, bv = init_linear(keys[5], keys[6], D, D)
    wq, bq = init_linear(keys[7], keys[8], D, D)
    wf, bf = init_linear(keys[9], keys[10], D, D)

    params = dict(
        wk=wk, bk=bk, wv=wv, bv=bv, wq=wq, bq=bq, wf=wf, bf=bf,
        gamma=jnp.ones((1, D), jnp.float32),   # nn.LayerNorm default weight
        beta=jnp.zeros((1, D), jnp.float32),   # nn.LayerNorm default bias
    )

    out = multi_head_attention(key_in, value_in, query_in, params, num_heads=H)
    jax.block_until_ready(out)
    assert out.shape == (B, L, D) and out.dtype == jnp.float32

    ref = _reference(key_in, value_in, query_in, params, num_heads=H)
    # Tolerance covers the approx-reciprocal softmax denominator.
    assert bool(jnp.allclose(out, ref, atol=2e-2, rtol=2e-2)), (
        float(jnp.max(jnp.abs(out - ref))))

    print("KERNEL_OK")
</pallas_src>

<mosaic_0001>
module attributes {stable_mosaic.version = 11 : i64} {
  func.func @_mha_fused_kernel(%arg0: memref<16x32xf32, #tpu.memory_space<vmem>>, %arg1: memref<16x32xf32, #tpu.memory_space<vmem>>, %arg2: memref<16x32xf32, #tpu.memory_space<vmem>>, %arg3: memref<32x32xf32, #tpu.memory_space<vmem>>, %arg4: memref<1x32xf32, #tpu.memory_space<vmem>>, %arg5: memref<32x32xf32, #tpu.memory_space<vmem>>, %arg6: memref<1x32xf32, #tpu.memory_space<vmem>>, %arg7: memref<32x32xf32, #tpu.memory_space<vmem>>, %arg8: memref<1x32xf32, #tpu.memory_space<vmem>>, %arg9: memref<32x32xf32, #tpu.memory_space<vmem>>, %arg10: memref<1x32xf32, #tpu.memory_space<vmem>>, %arg11: memref<1x32xf32, #tpu.memory_space<vmem>>, %arg12: memref<1x32xf32, #tpu.memory_space<vmem>>, %arg13: memref<16x32xf32, #tpu.memory_space<vmem>>) attributes {dimension_semantics = [], scalar_prefetch = 0 : i64, scratch_operands = 0 : i64, tpu.core_type = #tpu.core_type<tc>} {
    %c0 = arith.constant 0 : index
    %c0_0 = arith.constant 0 : index
    %0 = vector.load %arg0[%c0, %c0_0] : memref<16x32xf32, #tpu.memory_space<vmem>>, vector<16x32xf32>
    %c0_1 = arith.constant 0 : index
    %c0_2 = arith.constant 0 : index
    %1 = vector.load %arg1[%c0_1, %c0_2] : memref<16x32xf32, #tpu.memory_space<vmem>>, vector<16x32xf32>
    %c0_3 = arith.constant 0 : index
    %c0_4 = arith.constant 0 : index
    %2 = vector.load %arg2[%c0_3, %c0_4] : memref<16x32xf32, #tpu.memory_space<vmem>>, vector<16x32xf32>
    %c0_5 = arith.constant 0 : index
    %c0_6 = arith.constant 0 : index
    %3 = vector.load %arg3[%c0_5, %c0_6] : memref<32x32xf32, #tpu.memory_space<vmem>>, vector<32x32xf32>
    %cst = arith.constant dense<0.000000e+00> : vector<16x32xf32>
    %4 = tpu.matmul %0, %3, %cst {dimension_numbers = #tpu.dot_dimension_numbers<[1], [1], [0], [0], [0, 0, 1, 0], [], []>} : vector<16x32xf32>, vector<32x32xf32>, vector<16x32xf32> -> vector<16x32xf32>
    %c0_7 = arith.constant 0 : index
    %c0_8 = arith.constant 0 : index
    %5 = vector.load %arg4[%c0_7, %c0_8] : memref<1x32xf32, #tpu.memory_space<vmem>>, vector<1x32xf32>
    %6 = vector.broadcast %5 : vector<1x32xf32> to vector<16x32xf32>
    %7 = arith.addf %4, %6 : vector<16x32xf32>
    %c0_9 = arith.constant 0 : index
    %c0_10 = arith.constant 0 : index
    %8 = vector.load %arg5[%c0_9, %c0_10] : memref<32x32xf32, #tpu.memory_space<vmem>>, vector<32x32xf32>
    %cst_11 = arith.constant dense<0.000000e+00> : vector<16x32xf32>
    %9 = tpu.matmul %1, %8, %cst_11 {dimension_numbers = #tpu.dot_dimension_numbers<[1], [1], [0], [0], [0, 0, 1, 0], [], []>} : vector<16x32xf32>, vector<32x32xf32>, vector<16x32xf32> -> vector<16x32xf32>
    %c0_12 = arith.constant 0 : index
    %c0_13 = arith.constant 0 : index
    %10 = vector.load %arg6[%c0_12, %c0_13] : memref<1x32xf32, #tpu.memory_space<vmem>>, vector<1x32xf32>
    %11 = vector.broadcast %10 : vector<1x32xf32> to vector<16x32xf32>
    %12 = arith.addf %9, %11 : vector<16x32xf32>
    %c0_14 = arith.constant 0 : index
    %c0_15 = arith.constant 0 : index
    %13 = vector.load %arg7[%c0_14, %c0_15] : memref<32x32xf32, #tpu.memory_space<vmem>>, vector<32x32xf32>
    %cst_16 = arith.constant dense<0.000000e+00> : vector<16x32xf32>
    %14 = tpu.matmul %2, %13, %cst_16 {dimension_numbers = #tpu.dot_dimension_numbers<[1], [1], [0], [0], [0, 0, 1, 0], [], []>} : vector<16x32xf32>, vector<32x32xf32>, vector<16x32xf32> -> vector<16x32xf32>
    %c0_17 = arith.constant 0 : index
    %c0_18 = arith.constant 0 : index
    %15 = vector.load %arg8[%c0_17, %c0_18] : memref<1x32xf32, #tpu.memory_space<vmem>>, vector<1x32xf32>
    %16 = vector.broadcast %15 : vector<1x32xf32> to vector<16x32xf32>
    %17 = arith.addf %14, %16 : vector<16x32xf32>
    %cst_19 = arith.constant 2.82842708 : f32
    %18 = vector.broadcast %cst_19 : f32 to vector<16x32xf32>
    %19 = arith.mulf %17, %18 : vector<16x32xf32>
    %20 = vector.extract_strided_slice %19 {offsets = [0, 0], sizes = [4, 32], strides = [1, 1]} : vector<16x32xf32> to vector<4x32xf32>
    %21 = vector.extract_strided_slice %20 {offsets = [0, 0], sizes = [4, 16], strides = [1, 1]} : vector<4x32xf32> to vector<4x16xf32>
    %22 = vector.extract_strided_slice %20 {offsets = [0, 16], sizes = [4, 16], strides = [1, 1]} : vector<4x32xf32> to vector<4x16xf32>
    %23 = tpu.concatenate %21, %22 in 0 : vector<4x16xf32>, vector<4x16xf32> -> vector<8x16xf32>
    %24 = vector.extract_strided_slice %7 {offsets = [0, 0], sizes = [4, 32], strides = [1, 1]} : vector<16x32xf32> to vector<4x32xf32>
    %25 = vector.extract_strided_slice %24 {offsets = [0, 0], sizes = [4, 16], strides = [1, 1]} : vector<4x32xf32> to vector<4x16xf32>
    %26 = vector.extract_strided_slice %24 {offsets = [0, 16], sizes = [4, 16], strides = [1, 1]} : vector<4x32xf32> to vector<4x16xf32>
    %27 = tpu.concatenate %25, %26 in 0 : vector<4x16xf32>, vector<4x16xf32> -> vector<8x16xf32>
    %28 = vector.extract_strided_slice %12 {offsets = [0, 0], sizes = [4, 32], strides = [1, 1]} : vector<16x32xf32> to vector<4x32xf32>
    %29 = vector.extract_strided_slice %28 {offsets = [0, 0], sizes = [4, 16], strides = [1, 1]} : vector<4x32xf32> to vector<4x16xf32>
    %30 = vector.extract_strided_slice %28 {offsets = [0, 16], sizes = [4, 16], strides = [1, 1]} : vector<4x32xf32> to vector<4x16xf32>
    %31 = tpu.concatenate %29, %30 in 0 : vector<4x16xf32>, vector<4x16xf32> -> vector<8x16xf32>
    %cst_20 = arith.constant dense<0.000000e+00> : vector<8x8xf32>
    %32 = tpu.matmul %23, %27, %cst_20 {dimension_numbers = #tpu.dot_dimension_numbers<[1], [1], [0], [0], [0, 0, 1, 0], [], []>} : vector<8x16xf32>, vector<8x16xf32>, vector<8x8xf32> -> vector<8x8xf32>
    %cst_21 = arith.constant dense<0xFF800000> : vector<8xf32>
    %33 = vector.multi_reduction <maximumf>, %32, %cst_21 [1] : vector<8x8xf32> to vector<8xf32>
    %34 = vector.shape_cast %33 : vector<8xf32> to vector<8x1xf32>
    %35 = vector.broadcast %34 : vector<8x1xf32> to vector<8x8xf32>
    %36 = arith.subf %32, %35 : vector<8x8xf32>
    %37 = math.exp %36 : vector<8x8xf32>
    %cst_22 = arith.constant dense<0.000000e+00> : vector<8xf32>
    %38 = vector.multi_reduction <add>, %37, %cst_22 [1] : vector<8x8xf32> to vector<8xf32>
    %39 = vector.shape_cast %38 : vector<8xf32> to vector<8x1xf32>
    %40 = tpu.reciprocal %39 {approx = true} : vector<8x1xf32> -> vector<8x1xf32>
    %41 = vector.broadcast %40 : vector<8x1xf32> to vector<8x8xf32>
    %42 = arith.mulf %37, %41 : vector<8x8xf32>
    %cst_23 = arith.constant dense<0.000000e+00> : vector<8x16xf32>
    %43 = tpu.matmul %42, %31, %cst_23 {dimension_numbers = #tpu.dot_dimension_numbers<[1], [0], [0], [1], [0, 0, 1, 1], [], []>} : vector<8x8xf32>, vector<8x16xf32>, vector<8x16xf32> -> vector<8x16xf32>
    %44 = vector.extract_strided_slice %43 {offsets = [0, 0], sizes = [4, 16], strides = [1, 1]} : vector<8x16xf32> to vector<4x16xf32>
    %45 = vector.extract_strided_slice %43 {offsets = [4, 0], sizes = [4, 16], strides = [1, 1]} : vector<8x16xf32> to vector<4x16xf32>
    %46 = tpu.concatenate %44, %45 in 1 : vector<4x16xf32>, vector<4x16xf32> -> vector<4x32xf32>
    %47 = vector.extract_strided_slice %19 {offsets = [4, 0], sizes = [4, 32], strides = [1, 1]} : vector<16x32xf32> to vector<4x32xf32>
    %48 = vector.extract_strided_slice %47 {offsets = [0, 0], sizes = [4, 16], strides = [1, 1]} : vector<4x32xf32> to vector<4x16xf32>
    %49 = vector.extract_strided_slice %47 {offsets = [0, 16], sizes = [4, 16], strides = [1, 1]} : vector<4x32xf32> to vector<4x16xf32>
    %50 = tpu.concatenate %48, %49 in 0 : vector<4x16xf32>, vector<4x16xf32> -> vector<8x16xf32>
    %51 = vector.extract_strided_slice %7 {offsets = [4, 0], sizes = [4, 32], strides = [1, 1]} : vector<16x32xf32> to vector<4x32xf32>
    %52 = vector.extract_strided_slice %51 {offsets = [0, 0], sizes = [4, 16], strides = [1, 1]} : vector<4x32xf32> to vector<4x16xf32>
    %53 = vector.extract_strided_slice %51 {offsets = [0, 16], sizes = [4, 16], strides = [1, 1]} : vector<4x32xf32> to vector<4x16xf32>
    %54 = tpu.concatenate %52, %53 in 0 : vector<4x16xf32>, vector<4x16xf32> -> vector<8x16xf32>
    %55 = vector.extract_strided_slice %12 {offsets = [4, 0], sizes = [4, 32], strides = [1, 1]} : vector<16x32xf32> to vector<4x32xf32>
    %56 = vector.extract_strided_slice %55 {offsets = [0, 0], sizes = [4, 16], strides = [1, 1]} : vector<4x32xf32> to vector<4x16xf32>
    %57 = vector.extract_strided_slice %55 {offsets = [0, 16], sizes = [4, 16], strides = [1, 1]} : vector<4x32xf32> to vector<4x16xf32>
    %58 = tpu.concatenate %56, %57 in 0 : vector<4x16xf32>, vector<4x16xf32> -> vector<8x16xf32>
    %cst_24 = arith.constant dense<0.000000e+00> : vector<8x8xf32>
    %59 = tpu.matmul %50, %54, %cst_24 {dimension_numbers = #tpu.dot_dimension_numbers<[1], [1], [0], [0], [0, 0, 1, 0], [], []>} : vector<8x16xf32>, vector<8x16xf32>, vector<8x8xf32> -> vector<8x8xf32>
    %cst_25 = arith.constant dense<0xFF800000> : vector<8xf32>
    %60 = vector.multi_reduction <maximumf>, %59, %cst_25 [1] : vector<8x8xf32> to vector<8xf32>
    %61 = vector.shape_cast %60 : vector<8xf32> to vector<8x1xf32>
    %62 = vector.broadcast %61 : vector<8x1xf32> to vector<8x8xf32>
    %63 = arith.subf %59, %62 : vector<8x8xf32>
    %64 = math.exp %63 : vector<8x8xf32>
    %cst_26 = arith.constant dense<0.000000e+00> : vector<8xf32>
    %65 = vector.multi_reduction <add>, %64, %cst_26 [1] : vector<8x8xf32> to vector<8xf32>
    %66 = vector.shape_cast %65 : vector<8xf32> to vector<8x1xf32>
    %67 = tpu.reciprocal %66 {approx = true} : vector<8x1xf32> -> vector<8x1xf32>
    %68 = vector.broadcast %67 : vector<8x1xf32> to vector<8x8xf32>
    %69 = arith.mulf %64, %68 : vector<8x8xf32>
    %cst_27 = arith.constant dense<0.000000e+00> : vector<8x16xf32>
    %70 = tpu.matmul %69, %58, %cst_27 {dimension_numbers = #tpu.dot_dimension_numbers<[1], [0], [0], [1], [0, 0, 1, 1], [], []>} : vector<8x8xf32>, vector<8x16xf32>, vector<8x16xf32> -> vector<8x16xf32>
    %71 = vector.extract_strided_slice %70 {offsets = [0, 0], sizes = [4, 16], strides = [1, 1]} : vector<8x16xf32> to vector<4x16xf32>
    %72 = vector.extract_strided_slice %70 {offsets = [4, 0], sizes = [4, 16], strides = [1, 1]} : vector<8x16xf32> to vector<4x16xf32>
    %73 = tpu.concatenate %71, %72 in 1 : vector<4x16xf32>, vector<4x16xf32> -> vector<4x32xf32>
    %74 = vector.extract_strided_slice %19 {offsets = [8, 0], sizes = [4, 32], strides = [1, 1]} : vector<16x32xf32> to vector<4x32xf32>
    %75 = vector.extract_strided_slice %74 {offsets = [0, 0], sizes = [4, 16], strides = [1, 1]} : vector<4x32xf32> to vector<4x16xf32>
    %76 = vector.extract_strided_slice %74 {offsets = [0, 16], sizes = [4, 16], strides = [1, 1]} : vector<4x32xf32> to vector<4x16xf32>
    %77 = tpu.concatenate %75, %76 in 0 : vector<4x16xf32>, vector<4x16xf32> -> vector<8x16xf32>
    %78 = vector.extract_strided_slice %7 {offsets = [8, 0], sizes = [4, 32], strides = [1, 1]} : vector<16x32xf32> to vector<4x32xf32>
    %79 = vector.extract_strided_slice %78 {offsets = [0, 0], sizes = [4, 16], strides = [1, 1]} : vector<4x32xf32> to vector<4x16xf32>
    %80 = vector.extract_strided_slice %78 {offsets = [0, 16], sizes = [4, 16], strides = [1, 1]} : vector<4x32xf32> to vector<4x16xf32>
    %81 = tpu.concatenate %79, %80 in 0 : vector<4x16xf32>, vector<4x16xf32> -> vector<8x16xf32>
    %82 = vector.extract_strided_slice %12 {offsets = [8, 0], sizes = [4, 32], strides = [1, 1]} : vector<16x32xf32> to vector<4x32xf32>
    %83 = vector.extract_strided_slice %82 {offsets = [0, 0], sizes = [4, 16], strides = [1, 1]} : vector<4x32xf32> to vector<4x16xf32>
    %84 = vector.extract_strided_slice %82 {offsets = [0, 16], sizes = [4, 16], strides = [1, 1]} : vector<4x32xf32> to vector<4x16xf32>
    %85 = tpu.concatenate %83, %84 in 0 : vector<4x16xf32>, vector<4x16xf32> -> vector<8x16xf32>
    %cst_28 = arith.constant dense<0.000000e+00> : vector<8x8xf32>
    %86 = tpu.matmul %77, %81, %cst_28 {dimension_numbers = #tpu.dot_dimension_numbers<[1], [1], [0], [0], [0, 0, 1, 0], [], []>} : vector<8x16xf32>, vector<8x16xf32>, vector<8x8xf32> -> vector<8x8xf32>
    %cst_29 = arith.constant dense<0xFF800000> : vector<8xf32>
    %87 = vector.multi_reduction <maximumf>, %86, %cst_29 [1] : vector<8x8xf32> to vector<8xf32>
    %88 = vector.shape_cast %87 : vector<8xf32> to vector<8x1xf32>
    %89 = vector.broadcast %88 : vector<8x1xf32> to vector<8x8xf32>
    %90 = arith.subf %86, %89 : vector<8x8xf32>
    %91 = math.exp %90 : vector<8x8xf32>
    %cst_30 = arith.constant dense<0.000000e+00> : vector<8xf32>
    %92 = vector.multi_reduction <add>, %91, %cst_30 [1] : vector<8x8xf32> to vector<8xf32>
    %93 = vector.shape_cast %92 : vector<8xf32> to vector<8x1xf32>
    %94 = tpu.reciprocal %93 {approx = true} : vector<8x1xf32> -> vector<8x1xf32>
    %95 = vector.broadcast %94 : vector<8x1xf32> to vector<8x8xf32>
    %96 = arith.mulf %91, %95 : vector<8x8xf32>
    %cst_31 = arith.constant dense<0.000000e+00> : vector<8x16xf32>
    %97 = tpu.matmul %96, %85, %cst_31 {dimension_numbers = #tpu.dot_dimension_numbers<[1], [0], [0], [1], [0, 0, 1, 1], [], []>} : vector<8x8xf32>, vector<8x16xf32>, vector<8x16xf32> -> vector<8x16xf32>
    %98 = vector.extract_strided_slice %97 {offsets = [0, 0], sizes = [4, 16], strides = [1, 1]} : vector<8x16xf32> to vector<4x16xf32>
    %99 = vector.extract_strided_slice %97 {offsets = [4, 0], sizes = [4, 16], strides = [1, 1]} : vector<8x16xf32> to vector<4x16xf32>
    %100 = tpu.concatenate %98, %99 in 1 : vector<4x16xf32>, vector<4x16xf32> -> vector<4x32xf32>
    %101 = vector.extract_strided_slice %19 {offsets = [12, 0], sizes = [4, 32], strides = [1, 1]} : vector<16x32xf32> to vector<4x32xf32>
    %102 = vector.extract_strided_slice %101 {offsets = [0, 0], sizes = [4, 16], strides = [1, 1]} : vector<4x32xf32> to vector<4x16xf32>
    %103 = vector.extract_strided_slice %101 {offsets = [0, 16], sizes = [4, 16], strides = [1, 1]} : vector<4x32xf32> to vector<4x16xf32>
    %104 = tpu.concatenate %102, %103 in 0 : vector<4x16xf32>, vector<4x16xf32> -> vector<8x16xf32>
    %105 = vector.extract_strided_slice %7 {offsets = [12, 0], sizes = [4, 32], strides = [1, 1]} : vector<16x32xf32> to vector<4x32xf32>
    %106 = vector.extract_strided_slice %105 {offsets = [0, 0], sizes = [4, 16], strides = [1, 1]} : vector<4x32xf32> to vector<4x16xf32>
    %107 = vector.extract_strided_slice %105 {offsets = [0, 16], sizes = [4, 16], strides = [1, 1]} : vector<4x32xf32> to vector<4x16xf32>
    %108 = tpu.concatenate %106, %107 in 0 : vector<4x16xf32>, vector<4x16xf32> -> vector<8x16xf32>
    %109 = vector.extract_strided_slice %12 {offsets = [12, 0], sizes = [4, 32], strides = [1, 1]} : vector<16x32xf32> to vector<4x32xf32>
    %110 = vector.extract_strided_slice %109 {offsets = [0, 0], sizes = [4, 16], strides = [1, 1]} : vector<4x32xf32> to vector<4x16xf32>
    %111 = vector.extract_strided_slice %109 {offsets = [0, 16], sizes = [4, 16], strides = [1, 1]} : vector<4x32xf32> to vector<4x16xf32>
    %112 = tpu.concatenate %110, %111 in 0 : vector<4x16xf32>, vector<4x16xf32> -> vector<8x16xf32>
    %cst_32 = arith.constant dense<0.000000e+00> : vector<8x8xf32>
    %113 = tpu.matmul %104, %108, %cst_32 {dimension_numbers = #tpu.dot_dimension_numbers<[1], [1], [0], [0], [0, 0, 1, 0], [], []>} : vector<8x16xf32>, vector<8x16xf32>, vector<8x8xf32> -> vector<8x8xf32>
    %cst_33 = arith.constant dense<0xFF800000> : vector<8xf32>
    %114 = vector.multi_reduction <maximumf>, %113, %cst_33 [1] : vector<8x8xf32> to vector<8xf32>
    %115 = vector.shape_cast %114 : vector<8xf32> to vector<8x1xf32>
    %116 = vector.broadcast %115 : vector<8x1xf32> to vector<8x8xf32>
    %117 = arith.subf %113, %116 : vector<8x8xf32>
    %118 = math.exp %117 : vector<8x8xf32>
    %cst_34 = arith.constant dense<0.000000e+00> : vector<8xf32>
    %119 = vector.multi_reduction <add>, %118, %cst_34 [1] : vector<8x8xf32> to vector<8xf32>
    %120 = vector.shape_cast %119 : vector<8xf32> to vector<8x1xf32>
    %121 = tpu.reciprocal %120 {approx = true} : vector<8x1xf32> -> vector<8x1xf32>
    %122 = vector.broadcast %121 : vector<8x1xf32> to vector<8x8xf32>
    %123 = arith.mulf %118, %122 : vector<8x8xf32>
    %cst_35 = arith.constant dense<0.000000e+00> : vector<8x16xf32>
    %124 = tpu.matmul %123, %112, %cst_35 {dimension_numbers = #tpu.dot_dimension_numbers<[1], [0], [0], [1], [0, 0, 1, 1], [], []>} : vector<8x8xf32>, vector<8x16xf32>, vector<8x16xf32> -> vector<8x16xf32>
    %125 = vector.extract_strided_slice %124 {offsets = [0, 0], sizes = [4, 16], strides = [1, 1]} : vector<8x16xf32> to vector<4x16xf32>
    %126 = vector.extract_strided_slice %124 {offsets = [4, 0], sizes = [4, 16], strides = [1, 1]} : vector<8x16xf32> to vector<4x16xf32>
    %127 = tpu.concatenate %125, %126 in 1 : vector<4x16xf32>, vector<4x16xf32> -> vector<4x32xf32>
    %128 = tpu.concatenate %46, %73, %100, %127 in 0 : vector<4x32xf32>, vector<4x32xf32>, vector<4x32xf32>, vector<4x32xf32> -> vector<16x32xf32>
    %c0_36 = arith.constant 0 : index
    %c0_37 = arith.constant 0 : index
    %129 = vector.load %arg9[%c0_36, %c0_37] : memref<32x32xf32, #tpu.memory_space<vmem>>, vector<32x32xf32>
    %cst_38 = arith.constant dense<0.000000e+00> : vector<16x32xf32>
    %130 = tpu.matmul %128, %129, %cst_38 {dimension_numbers = #tpu.dot_dimension_numbers<[1], [1], [0], [0], [0, 0, 1, 0], [], []>} : vector<16x32xf32>, vector<32x32xf32>, vector<16x32xf32> -> vector<16x32xf32>
    %c0_39 = arith.constant 0 : index
    %c0_40 = arith.constant 0 : index
    %131 = vector.load %arg10[%c0_39, %c0_40] : memref<1x32xf32, #tpu.memory_space<vmem>>, vector<1x32xf32>
    %132 = vector.broadcast %131 : vector<1x32xf32> to vector<16x32xf32>
    %133 = arith.addf %130, %132 : vector<16x32xf32>
    %134 = arith.addf %2, %133 : vector<16x32xf32>
    %cst_41 = arith.constant dense<0.000000e+00> : vector<16xf32>
    %135 = vector.multi_reduction <add>, %134, %cst_41 [1] : vector<16x32xf32> to vector<16xf32>
    %136 = vector.shape_cast %135 : vector<16xf32> to vector<16x1xf32>
    %cst_42 = arith.constant 3.200000e+01 : f32
    %137 = vector.broadcast %cst_42 : f32 to vector<16x1xf32>
    %138 = arith.divf %136, %137 : vector<16x1xf32>
    %139 = vector.broadcast %138 : vector<16x1xf32> to vector<16x32xf32>
    %140 = arith.subf %134, %139 : vector<16x32xf32>
    %141 = arith.mulf %140, %140 : vector<16x32xf32>
    %cst_43 = arith.constant dense<0.000000e+00> : vector<16xf32>
    %142 = vector.multi_reduction <add>, %141, %cst_43 [1] : vector<16x32xf32> to vector<16xf32>
    %143 = vector.shape_cast %142 : vector<16xf32> to vector<16x1xf32>
    %cst_44 = arith.constant 3.200000e+01 : f32
    %144 = vector.broadcast %cst_44 : f32 to vector<16x1xf32>
    %145 = arith.divf %143, %144 : vector<16x1xf32>
    %cst_45 = arith.constant 9.99999974E-6 : f32
    %146 = vector.broadcast %cst_45 : f32 to vector<16x1xf32>
    %147 = arith.addf %145, %146 : vector<16x1xf32>
    %148 = math.rsqrt %147 : vector<16x1xf32>
    %149 = vector.broadcast %148 : vector<16x1xf32> to vector<16x32xf32>
    %150 = arith.mulf %140, %149 : vector<16x32xf32>
    %c0_46 = arith.constant 0 : index
    %c0_47 = arith.constant 0 : index
    %151 = vector.load %arg11[%c0_46, %c0_47] : memref<1x32xf32, #tpu.memory_space<vmem>>, vector<1x32xf32>
    %152 = vector.broadcast %151 : vector<1x32xf32> to vector<16x32xf32>
    %153 = arith.mulf %150, %152 : vector<16x32xf32>
    %c0_48 = arith.constant 0 : index
    %c0_49 = arith.constant 0 : index
    %154 = vector.load %arg12[%c0_48, %c0_49] : memref<1x32xf32, #tpu.memory_space<vmem>>, vector<1x32xf32>
    %155 = vector.broadcast %154 : vector<1x32xf32> to vector<16x32xf32>
    %156 = arith.addf %153, %155 : vector<16x32xf32>
    %c0_50 = arith.constant 0 : index
    %c0_51 = arith.constant 0 : index
    %157 = vector.load %arg13[%c0_50, %c0_51] : memref<16x32xf32, #tpu.memory_space<vmem>>, vector<16x32xf32>
    tpu.vector_store %arg13[%c0_50, %c0_51], %156 {strides = array<i32>} : memref<16x32xf32, #tpu.memory_space<vmem>>, vector<16x32xf32>,
    return
  }
}

</mosaic_0001>

<bundles_post_ra>
// kernel: tpu_custom_call.1
= control target key start
LH: loop header
LB: loop body
LE: loop exit
PB: predicated region body
PF: predicated region fallthrough
CT: control target
= control target key end

     0   :  { %18 = vsyncpa [#allocation3], 0  ;;  %s2218_s0 = inlined_call_operand.hbm [shape: f32[16,32], index: 0, kind: input, shape index: {}]   ;;  %s2219_s1 = inlined_call_operand.hbm [shape: f32[16,32], index: 1, kind: input, shape index: {}]   ;;  %s2220_s2 = inlined_call_operand.hbm [shape: f32[16,32], index: 2, kind: input, shape index: {}]   ;;  %s2221_s3 = inlined_call_operand.hbm [shape: f32[32,32], index: 3, kind: input, shape index: {}]   ;;  %s2222_s4 = inlined_call_operand.vmem [shape: f32[1,32], index: 4, kind: input, shape index: {}]   ;;  %s2223_s5 = inlined_call_operand.hbm [shape: f32[32,32], index: 5, kind: input, shape index: {}]   ;;  %s2224_s6 = inlined_call_operand.vmem [shape: f32[1,32], index: 6, kind: input, shape index: {}]   ;;  %s2225_s7 = inlined_call_operand.hbm [shape: f32[32,32], index: 7, kind: input, shape index: {}]   ;;  %s2226_s8 = inlined_call_operand.hbm [shape: f32[1,32], index: 8, kind: input, shape index: {}]   ;;  %s2227_s9 = inlined_call_operand.vmem [shape: f32[32,32], index: 9, kind: input, shape index: {}]   ;;  %s2228_s10 = inlined_call_operand.vmem [shape: f32[1,32], index: 10, kind: input, shape index: {}]   ;;  %s2229_s11 = inlined_call_operand.vmem [shape: f32[1,32], index: 11, kind: input, shape index: {}]   ;;  %s2230_s12 = inlined_call_operand.vmem [shape: f32[1,32], index: 12, kind: input, shape index: {}]   ;;  %s2231_s13 = inlined_call_operand.hbm [shape: f32[16,32], index: 13, kind: output, shape index: {}]  }
   0x1   :  { %19 = vsyncpa [#allocation6], 0 }
   0x2   :  { %20 = vsyncpa [#allocation9], 0 }
   0x3   :  { %21 = vsyncpa [#allocation12], 0 }
   0x4   :  { %22 = vsyncpa [#allocation4], 0  ;;  %s1807_s25 = smov [#allocation5]   ;;  %s1808_s27 = smov [#allocation8]  }
   0x5   :  { %s40_s26 = sshll.u32 %s1807_s25, 4  ;;  %s64_s28 = sshll.u32 %s1808_s27, 4  ;;  %s41_s26 = int_to_ptr.vmem [resolvable:$true] %s40_s26  ;;  %s1891_s28 = int_to_ptr.vmem [resolvable:$true] %s64_s28 }
   0x6   :  { %s1621_s14 = scalar_lea.hbm %s2219_s1, 256 }
   0x7   :  { %p1622_p0 = scmp.ne.s32.totalorder %s2219_s1, %s1621_s14  ;;  %p1625_p1 = scmp.lt.u32.totalorder %s1621_s14, %s2219_s1 }
   0x9   :  { %p1627_p2 = pnand %p1625_p1, %p1622_p0 }
   0xb   :  { %1630 = shalt.err (!%p1627_p2)
}
   0xc   :  { %s1631_s19 = scalar_lea.vmem %s41_s26, 256  ;;  %p1636_p4 = scmp.lt.s32.totalorder %s41_s26, %s41_s26 }
   0xd   :  { %p1632_p3 = scmp.ne.s32.totalorder %s41_s26, %s1631_s19  ;;  %p1637_p5 = scmp.lt.s32.totalorder %s1631_s19, %s1631_s19 }
   0xf   :  { %p1638_p6 = por %p1637_p5, %p1636_p4 }
  0x11   :  { %p1639_p7 = pnand %p1638_p6, %p1632_p3 }
  0x13   :  { %1642 = shalt.err (!%p1639_p7)
}
  0x14   :  { %s1809_s20 = smov 128   ;;  %s1810_s21 = smov 8  }
  0x15   :  { %46 = dma.hbm_to_vmem [thread:$0]  %s2219_s1, 256, %s41_s26, [#allocation6], %s1809_s20, %s1809_s20, %s1810_s21  }
  0x16   :  { %s1643_s27 = scalar_lea.hbm %s2221_s3, 512 }
  0x17   :  { %p1644_p8 = scmp.ne.s32.totalorder %s2221_s3, %s1643_s27  ;;  %p1647_p9 = scmp.lt.u32.totalorder %s1643_s27, %s2221_s3 }
  0x19   :  { %p1649_p10 = pnand %p1647_p9, %p1644_p8 }
  0x1b   :  { %1652 = shalt.err (!%p1649_p10)
}
  0x1c   :  { %s1653_s16 = scalar_lea.vmem %s1891_s28, 512  ;;  %p1658_p12 = scmp.lt.s32.totalorder %s1891_s28, %s1891_s28 }
  0x1d   :  { %p1654_p11 = scmp.ne.s32.totalorder %s1891_s28, %s1653_s16  ;;  %p1659_p13 = scmp.lt.s32.totalorder %s1653_s16, %s1653_s16 }
  0x1f   :  { %p1660_p0 = por %p1659_p13, %p1658_p12 }
  0x21   :  { %p1661_p1 = pnand %p1660_p0, %p1654_p11 }
  0x23   :  { %1664 = shalt.err (!%p1661_p1)
}
  0x24   :  { %70 = dma.hbm_to_vmem [thread:$0]  %s2221_s3, 512, %s1891_s28, [#allocation9], %s1809_s20, %s1809_s20, %s1810_s21  }
  0x25   :  { %s1811_s17 = smov [#allocation11]   ;;  %s1812_s19 = smov [#allocation2]  }
  0x26   :  { %s92_s18 = sshll.u32 %s1811_s17, 4  ;;  %s28_s22 = sshll.u32 %s1812_s19, 4  ;;  %s93_s18 = int_to_ptr.vmem [resolvable:$true] %s92_s18  ;;  %s1928_s22 = int_to_ptr.vmem [resolvable:$true] %s28_s22 }
  0x27   :  { %s1665_s25 = scalar_lea.hbm %s2225_s7, 512 }
  0x28   :  { %p1666_p2 = scmp.ne.s32.totalorder %s2225_s7, %s1665_s25  ;;  %p1669_p3 = scmp.lt.u32.totalorder %s1665_s25, %s2225_s7 }
  0x2a   :  { %p1671_p4 = pnand %p1669_p3, %p1666_p2 }
  0x2c   :  { %1674 = shalt.err (!%p1671_p4)
}
  0x2d   :  { %s1675_s3 = scalar_lea.vmem %s93_s18, 512  ;;  %p1680_p6 = scmp.lt.s32.totalorder %s93_s18, %s93_s18 }
  0x2e   :  { %p1676_p5 = scmp.ne.s32.totalorder %s93_s18, %s1675_s3  ;;  %p1681_p7 = scmp.lt.s32.totalorder %s1675_s3, %s1675_s3 }
  0x30   :  { %p1682_p8 = por %p1681_p7, %p1680_p6 }
  0x32   :  { %p1683_p9 = pnand %p1682_p8, %p1676_p5 }
  0x34   :  { %1686 = shalt.err (!%p1683_p9)
}
  0x35   :  { %98 = dma.hbm_to_vmem [thread:$0]  %s2225_s7, 512, %s93_s18, [#allocation12], %s1809_s20, %s1809_s20, %s1810_s21  }
  0x36   :  { %s1687_s26 = scalar_lea.hbm %s2218_s0, 256 }
  0x37   :  { %p1688_p10 = scmp.ne.s32.totalorder %s2218_s0, %s1687_s26  ;;  %p1691_p11 = scmp.lt.u32.totalorder %s1687_s26, %s2218_s0 }
  0x39   :  { %p1693_p12 = pnand %p1691_p11, %p1688_p10 }
  0x3b   :  { %1696 = shalt.err (!%p1693_p12)
}
  0x3c   :  { %s1697_s25 = scalar_lea.vmem %s1928_s22, 256  ;;  %p1702_p0 = scmp.lt.s32.totalorder %s1928_s22, %s1928_s22 }
  0x3d   :  { %p1698_p13 = scmp.ne.s32.totalorder %s1928_s22, %s1697_s25  ;;  %p1703_p1 = scmp.lt.s32.totalorder %s1697_s25, %s1697_s25 }
  0x3f   :  { %p1704_p2 = por %p1703_p1, %p1702_p0 }
  0x41   :  { %p1705_p3 = pnand %p1704_p2, %p1698_p13 }
  0x43   :  { %1708 = shalt.err (!%p1705_p3)
}
  0x44   :  { %34 = dma.hbm_to_vmem [thread:$0]  %s2218_s0, 256, %s1928_s22, [#allocation3], %s1809_s20, %s1809_s20, %s1810_s21  }
  0x45   :  { %s1813_s27 = smov [#allocation7]   ;;  %s1814_s30 = smov [#allocation10]  }
  0x46   :  { %s52_s29 = sshll.u32 %s1813_s27, 4  ;;  %s78_s14 = sshll.u32 %s1814_s30, 4  ;;  %s53_s29 = int_to_ptr.vmem [resolvable:$true] %s52_s29  ;;  %s1965_s14 = int_to_ptr.vmem [resolvable:$true] %s78_s14 }
  0x47   :  { %s1709_s15 = scalar_lea.hbm %s2220_s2, 256 }
  0x48   :  { %p1710_p4 = scmp.ne.s32.totalorder %s2220_s2, %s1709_s15  ;;  %p1713_p5 = scmp.lt.u32.totalorder %s1709_s15, %s2220_s2 }
  0x4a   :  { %p1715_p6 = pnand %p1713_p5, %p1710_p4 }
  0x4c   :  { %1718 = shalt.err (!%p1715_p6)
}
  0x4d   :  { %s1719_s0 = scalar_lea.vmem %s53_s29, 256  ;;  %p1724_p8 = scmp.lt.s32.totalorder %s53_s29, %s53_s29 }
  0x4e   :  { %p1720_p7 = scmp.ne.s32.totalorder %s53_s29, %s1719_s0  ;;  %p1725_p9 = scmp.lt.s32.totalorder %s1719_s0, %s1719_s0 }
  0x50   :  { %p1726_p10 = por %p1725_p9, %p1724_p8 }
  0x52   :  { %p1727_p11 = pnand %p1726_p10, %p1720_p7 }
  0x54   :  { %1730 = shalt.err (!%p1727_p11)
}
  0x55   :  { %58 = dma.hbm_to_vmem [thread:$0]  %s2220_s2, 256, %s53_s29, [#allocation6], %s1809_s20, %s1809_s20, %s1810_s21  }
  0x56   :  { %s1731_s25 = scalar_lea.hbm %s2223_s5, 512 }
  0x57   :  { %p1732_p12 = scmp.ne.s32.totalorder %s2223_s5, %s1731_s25  ;;  %p1735_p13 = scmp.lt.u32.totalorder %s1731_s25, %s2223_s5 }
  0x59   :  { %p1737_p0 = pnand %p1735_p13, %p1732_p12 }
  0x5b   :  { %1740 = shalt.err (!%p1737_p0)
}
  0x5c   :  { %s1741_s3 = scalar_lea.vmem %s1965_s14, 512  ;;  %p1746_p2 = scmp.lt.s32.totalorder %s1965_s14, %s1965_s14 }
  0x5d   :  { %p1742_p1 = scmp.ne.s32.totalorder %s1965_s14, %s1741_s3  ;;  %p1747_p3 = scmp.lt.s32.totalorder %s1741_s3, %s1741_s3 }
  0x5f   :  { %p1748_p4 = por %p1747_p3, %p1746_p2 }
  0x61   :  { %p1749_p5 = pnand %p1748_p4, %p1742_p1 }
  0x63   :  { %1752 = shalt.err (!%p1749_p5)
}
  0x64   :  { %84 = dma.hbm_to_vmem [thread:$0]  %s2223_s5, 512, %s1965_s14, [#allocation9], %s1809_s20, %s1809_s20, %s1810_s21  }
  0x65   :  { %s1815_s28 = smov [#allocation13]   ;;  %s1753_s26 = scalar_lea.hbm %s2226_s8, 16 }
  0x66   :  { %s105_s15 = sshll.u32 %s1815_s28, 4  ;;  %p1754_p6 = scmp.ne.s32.totalorder %s2226_s8, %s1753_s26  ;;  %s106_s15 = int_to_ptr.vmem [resolvable:$true] %s105_s15 }
  0x67   :  { %p1757_p7 = scmp.lt.u32.totalorder %s1753_s26, %s2226_s8 }
  0x69   :  { %p1759_p8 = pnand %p1757_p7, %p1754_p6 }
  0x6b   :  { %1762 = shalt.err (!%p1759_p8)
}
  0x6c   :  { %s1763_s23 = scalar_lea.vmem %s106_s15, 16  ;;  %s1767_s5 = scalar_lea.vmem %s106_s15, 32 }
  0x6d   :  { %p1764_p9 = scmp.ne.s32.totalorder %s106_s15, %s1763_s23  ;;  %p1768_p10 = scmp.lt.s32.totalorder %s106_s15, %s106_s15 }
  0x6e   :  { %p1769_p11 = scmp.lt.s32.totalorder %s1767_s5, %s1763_s23 }
  0x70   :  { %p1770_p12 = por %p1769_p11, %p1768_p10 }
  0x72   :  { %p1771_p13 = pnand %p1770_p12, %p1764_p9 }
  0x74   :  { %1774 = shalt.err (!%p1771_p13)
}
  0x75   :  { %108 = dma.hbm_to_vmem [thread:$0]  %s2226_s8, 16, %s106_s15, [#allocation12]  }
  0x76   :  { %1797 = dma.done.wait [#allocation3], 256  }
  0x77   :  { %1798 = vsyncadd [#allocation3], 4294967040 }
  0x78   :  { %1799 = dma.done.wait [#allocation6], 512  }
  0x79   :  { %1800 = vsyncadd [#allocation6], 4294966784 }
  0x7a   :  { %1801 = dma.done.wait [#allocation9], 1024  }
  0x7b   :  { %1802 = vsyncadd [#allocation9], 4294966272 }
  0x7c   :  { %1803 = dma.done.wait [#allocation12], 528  }
  0x7d   :  { %1804 = vsyncadd [#allocation12], 4294966768  ;;  %vm155_vm0 = vcmask 261120   ;;  %v144_v1 = vld [vmem:[#allocation8] sm:$0xff]  ;;  %v145_v2 = vld [vmem:[#allocation8 + $0x8] sm:$0xff]  ;;  %v1816_v25 = vmov 0.0  }
  0x7e   :  { %vm2016_vm1 = vmpackc.low %vm155_vm0, %vm155_vm0  ;;  %v146_v3 = vld [vmem:[#allocation8 + $0x10] sm:$0xff]  ;;  %v1539_v4 = vpack.c.bf16 %v145_v2, %v144_v1  ;;  %v147_v5 = vld [vmem:[#allocation8 + $0x18] sm:$0xff]  ;;  %s1817_s27 = smov 112   ;;  %vm1818_vm2 = vmmov 0   ;;  %vm464_vm3 = vcmask 1043456   ;;  %vm478_vm4 = vcmask 130048  }
  0x7f   :  { %v138_v6 = vld [vmem:[#allocation2] sm:$0xff]  ;;  %v1545_v7 = vpack.c.bf16 %v147_v5, %v146_v3  ;;  %v249_v8 = vld [vmem:[#allocation10] sm:$0xff]  ;;  %v250_v9 = vld [vmem:[#allocation10 + $0x8] sm:$0xff]  ;;  %vm555_vm5 = vcmask 64512   ;;  %s1820_s22 = smov [#allocation14]  }
  0x80   :  { %1463 = vmatprep.mubr.msk.f32.mxu0 %vm155_vm0, %v138_v6  ;;  %1541 = vmatprep.subr.msk.bf16.mxu0 %vm2016_vm1, %v1539_v4  ;;  %v1551_v10 = vpack.c.bf16 %v250_v9, %v249_v8  ;;  %v251_v11 = vld [vmem:[#allocation10 + $0x10] sm:$0xff]  ;;  %v252_v12 = vld [vmem:[#allocation10 + $0x18] sm:$0xff]  ;;  %v140_v14 = vld [vmem:[#allocation5] sm:$0xff]  ;;  %s1358_s19 = sshll.u32 %s1820_s22, 4  ;;  %s1359_s19 = int_to_ptr.vmem [resolvable:$true] %s1358_s19 }
  0x81   :  { %1544 = vmatpush3.bf16.xpose.msk.msra.mxu0 %vm2016_vm1, %v1539_v4  ;;  %v1557_v13 = vpack.c.bf16 %v252_v12, %v251_v11  ;;  %v353_v15 = vld [vmem:[#allocation11] sm:$0xff]  ;;  %v354_v16 = vld [vmem:[#allocation11 + $0x8] sm:$0xff]  ;;  %1474 = vmatprep.mubr.msk.f32.mxu1 %vm155_vm0, %v140_v14  ;;  %v355_v18 = vld [vmem:[#allocation11 + $0x10] sm:$0xff]  ;;  %s1775_s23 = scalar_lea.vmem %s1359_s19, 256  ;;  %p1780_p1 = scmp.lt.s32.totalorder %s1359_s19, %s1359_s19 }
  0x82   :  { %1547 = vmatprep.subr.msk.bf16.mxu0 %vm2016_vm1, %v1545_v7  ;;  %1553 = vmatprep.subr.msk.bf16.mxu1 %vm2016_vm1, %v1551_v10  ;;  %v1563_v17 = vpack.c.bf16 %v354_v16, %v353_v15  ;;  %v356_v19 = vld [vmem:[#allocation11 + $0x18] sm:$0xff]  ;;  %v2040_v22 = vld [vmem:[#allocation7] sm:$0xff]  ;;  %v141_v23 = vld [vmem:[#allocation5 + $0x8] sm:$0xff]  ;;  %p1776_p0 = scmp.ne.s32.totalorder %s1359_s19, %s1775_s23  ;;  %p1781_p2 = scmp.lt.s32.totalorder %s1775_s23, %s1775_s23 }
  0x83   :  { %1556 = vmatpush3.bf16.xpose.msk.msra.mxu1 %vm2016_vm1, %v1551_v10  ;;  %v139_v20 = vld [vmem:[#allocation2 + $0x8] sm:$0xff]  ;;  %v1569_v21 = vpack.c.bf16 %v356_v19, %v355_v18  ;;  %v1373_v26 = vld [vmem:[%s2222_s4] ss:$0 sm:$0xff]  ;;  %v1387_v36 = vld [vmem:[#allocation13] ss:$0 sm:$0xff]  ;;  %s1819_s4 = smov 16  }
  0x84   :  { %1559 = vmatprep.subr.msk.bf16.mxu1 %vm2016_vm1, %v1557_v13  ;;  %v2052_v24 = vld [vmem:[#allocation7 + $0x8] sm:$0xff]  ;;  %v1380_v32 = vld [vmem:[%s2224_s6] ss:$0 sm:$0xff]  ;;  %p1782_p3 = por %p1781_p2, %p1780_p1 }
  0x85   :  { %v1406_v0 = vld [vmem:[%s2228_s10] ss:$0 sm:$0xff] }
  0x86   :  { %p1783_p4 = pnand %p1782_p3, %p1776_p0 }
  0x89   :  { %1550 = vmatpush3.bf16.xpose.msk.msra.mxu0 %vm2016_vm1, %v1545_v7 }
  0x8a   :  { %1565 = vmatprep.subr.msk.bf16.mxu0 %vm2016_vm1, %v1563_v17 }
  0x8b   :  { %1562 = vmatpush3.bf16.xpose.msk.msra.mxu1 %vm2016_vm1, %v1557_v13 }
  0x8c   :  { %1488 = vmatprep.subr.mxu1 %v1816_v25 }
  0x90   :  { %1464 = vmatmul.mubr.msk.f32.vlgmr.msra.gmra.mrb[0].mxu0 %vm155_vm0, %v139_v20 }
  0x91   :  { %1568 = vmatpush3.bf16.xpose.msk.msra.mxu0 %vm2016_vm1, %v1563_v17  ;;  %1485 = vmatprep.mubr.msk.f32.mxu0 %vm155_vm0, %v2040_v22 }
  0x92   :  { %1571 = vmatprep.subr.msk.bf16.mxu0 %vm2016_vm1, %v1569_v21  ;;  %1475 = vmatmul.mubr.msk.f32.vlgmr.msra.gmra.mrb[0].mxu1 %vm155_vm0, %v141_v23 }
  0x93   :  { %1490 = vmatprep.mubr.msk.f32.mxu1 %vm1818_vm2, %v1816_v25 }
  0x99   :  { %1574 = vmatpush3.bf16.xpose.msk.msra.mxu0 %vm2016_vm1, %v1569_v21 }
  0xa0   :  { %1486 = vmatmul.mubr.msk.f32.vlgmr.msra.gmra.mrb[2].mxu0 %vm155_vm0, %v2052_v24 }
 0x163   :  { %v1465_v27 = vpop.f32.mrb[0].mxu0 }
 0x164   :  { %v2060_v28 = vadd.f32 %v1465_v27, %v1373_v26  ;;  %v240_v29 = vpop.f32.mrb[1].mxu0 }
 0x165   :  { %v241_v30 = vadd.f32 %v1373_v26, %v240_v29  ;;  %v1476_v31 = vpop.f32.mrb[0].mxu1 }
 0x166   :  { %v2065_v34 = vadd.f32 %v1476_v31, %v1380_v32  ;;  %v344_v35 = vpop.f32.mrb[1].mxu1  ;;  %v834_v17 = vrot.slane %v2060_v28, 4 }
 0x167   :  { %v467_v33 = vrot.slane %v241_v30, 4  ;;  %v2070_v42 = vadd.f32 %v1380_v32, %v344_v35 }
 0x168   :  { %v840_v35 = vrot.slane %v2065_v34, 4 }
 0x169   :  { %468 = vrot.lane.b32.xlu0 %v467_v33, %s1817_s27  ;;  %v473_v44 = vrot.slane %v2070_v42, 4 }
 0x173   :  { %v1487_v37 = vpop.f32.mrb[2].mxu0 }
 0x174   :  { %v454_v38 = vadd.f32 %v1487_v37, %v1387_v36  ;;  %v448_v39 = vpop.f32.mrb[3].mxu0 }
 0x175   :  { %v449_v40 = vadd.f32 %v1387_v36, %v448_v39 }
 0x176   :  { %v2102_v8 = vmul.f32 2.828427, %v454_v38 }
 0x177   :  { %v457_v41 = vmul.f32 2.828427, %v449_v40 }
 0x178   :  { %v828_v9 = vrot.slane %v2102_v8, 4 }
 0x179   :  { %v460_v43 = vrot.slane %v457_v41, 4 }
 0x17b   :  { %461 = vrot.lane.b32.xlu0 %v460_v43, %s1817_s27 }
 0x17f   :  { %474 = vrot.lane.b32.xlu0 %v473_v44, %s1817_s27 }
 0x183   :  { %647 = vrot.lane.b32.xlu0 %v457_v41, %s1817_s27 }
 0x1db   :  { %v469_v45 = vpop.permute.xlu0 %468 }
 0x1dc   :  { %v471_v46 = vsel %vm464_vm3, %v241_v30, %v469_v45 }
 0x1dd   :  { %1489 = vmatpush3.xpose.msk.msra.mxu1 %vm478_vm4, %v471_v46 }
 0x1de   :  { %1493 = vmatprep.subr.mxu1 %v1816_v25 }
 0x1ed   :  { %v462_v47 = vpop.permute.xlu0 %461 }
 0x1ee   :  { %v465_v48 = vsel %vm464_vm3, %v457_v41, %v462_v47 }
 0x1ef   :  { %1491 = vmatmul.mubr.msk.f32.vlgmr.msra.gmra.mrb[2].mxu1 %vm478_vm4, %v465_v48 }
 0x1f0   :  { %1495 = vmatprep.mubr.msk.f32.mxu1 %vm1818_vm2, %v1816_v25 }
 0x1f1   :  { %v475_v49 = vpop.permute.xlu0 %474 }
 0x1f2   :  { %v477_v50 = vsel %vm464_vm3, %v2070_v42, %v475_v49 }
 0x1f3   :  { %1494 = vmatpush3.msra.mxu1 %v477_v50 }
 0x1f4   :  { %1498 = vmatprep.subr.mxu1 %v1816_v25 }
 0x1f5   :  { %v648_v63 = vpop.permute.xlu0 %647 }
 0x1f6   :  { %v650_v2 = vsel %vm464_vm3, %v460_v43, %v648_v63 }
 0x2c2   :  { %v551_v51 = vpop.f32.mrb[2].mxu1 }
 0x2c3   :  { %v1492_v52 = vpop.f32.mrb[3].mxu1  ;;  %v556_v53 = vsel %vm555_vm5, %v551_v51, -inf }
 0x2c4   :  { %557 = vmax.xlane.f32.xlu1 %v556_v53 }
 0x351   :  { %v558_v54 = vpop.xlane.xlu1 %557 }
 0x352   :  { %v559_v55 = vsub.f32 %v551_v51, %v558_v54 }
 0x354   :  { %v560_v56 = vmul.f32 1.442695, %v559_v55 }
 0x356   :  { %1601 = vpow2.f32 %v560_v56 }
 0x360   :  { %v1602_v57 = vpop.eup %1601 }
 0x361   :  { %v562_v58 = vsel %vm555_vm5, %v1602_v57, 0.0 }
 0x362   :  { %563 = vadd.xlane.f32.xlu1 %v562_v58 }
 0x373   :  { %652 = vrot.lane.b32.xlu1 %v241_v30, %s1817_s27 }
 0x3ef   :  { %v564_v59 = vpop.xlane.xlu1 %563 }
 0x3f0   :  { %1603 = vrcp.f32 %v564_v59 }
 0x3f3   :  { %v653_v61 = vpop.permute.xlu1 %652 }
 0x3f4   :  { %v655_v1 = vsel %vm464_vm3, %v467_v33, %v653_v61 }
 0x3fa   :  { %v1604_v60 = vpop.eup %1603 }
 0x3fb   :  { %v566_v62 = vmul.f32 %v1604_v60, %v1602_v57 }
 0x3fd   :  { %1496 = vmatmul.mubr.msk.f32.vlgmr.msra.gmra.mrb[4].mxu1 %vm555_vm5, %v566_v62 }
 0x3fe   :  { %1499 = vmatpush3.xpose.msk.msra.mxu1 %vm478_vm4, %v655_v1  ;;  %1500 = vmatprep.mubr.msk.f32.mxu1 %vm1818_vm2, %v1816_v25 }
 0x3ff   :  { %1503 = vmatprep.subr.mxu1 %v1816_v25 }
 0x401   :  { %1501 = vmatmul.mubr.msk.f32.vlgmr.msra.gmra.mrb[6].mxu1 %vm478_vm4, %v650_v2 }
 0x402   :  { %1505 = vmatprep.mubr.msk.f32.mxu1 %vm1818_vm2, %v1816_v25 }
 0x4d0   :  { %v2099_v3 = vpop.f32.mrb[4].mxu1 }
 0x4d1   :  { %v1497_v4 = vpop.f32.mrb[5].mxu1  ;;  %v641_v61 = vrot.slane %v2099_v3, 4 }
 0x4d4   :  { %v733_v5 = vpop.f32.mrb[6].mxu1 }
 0x4d5   :  { %v1502_v6 = vpop.f32.mrb[7].mxu1  ;;  %v737_v7 = vsel %vm555_vm5, %v733_v5, -inf }
 0x4d6   :  { %738 = vmax.xlane.f32.xlu0 %v737_v7 }
 0x4ec   :  { %657 = vrot.lane.b32.xlu0 %v2070_v42, %s1817_s27 }
 0x4f0   :  { %829 = vrot.lane.b32.xlu0 %v828_v9, %s1817_s27 }
 0x563   :  { %v739_v10 = vpop.xlane.xlu0 %738 }
 0x564   :  { %v740_v11 = vsub.f32 %v733_v5, %v739_v10 }
 0x566   :  { %v741_v12 = vmul.f32 1.442695, %v740_v11  ;;  %v1203_v11 = vld [vmem:[%s2227_s9 + $0x18] sm:$0xff] }
 0x567   :  { %v658_v13 = vpop.permute.xlu0 %657 }
 0x568   :  { %1605 = vpow2.f32 %v741_v12  ;;  %v660_v14 = vsel %vm464_vm3, %v473_v44, %v658_v13 }
 0x569   :  { %1504 = vmatpush3.msra.mxu1 %v660_v14 }
 0x56a   :  { %1508 = vmatprep.subr.mxu1 %v1816_v25 }
 0x56b   :  { %v830_v23 = vpop.permute.xlu0 %829 }
 0x56c   :  { %v832_v27 = vsel %vm464_vm3, %v2102_v8, %v830_v23 }
 0x572   :  { %v1606_v15 = vpop.eup %1605 }
 0x573   :  { %v743_v16 = vsel %vm555_vm5, %v1606_v15, 0.0 }
 0x574   :  { %744 = vadd.xlane.f32.xlu1 %v743_v16 }
 0x585   :  { %835 = vrot.lane.b32.xlu1 %v834_v17, %s1817_s27 }
 0x601   :  { %v745_v18 = vpop.xlane.xlu1 %744 }
 0x602   :  { %1607 = vrcp.f32 %v745_v18 }
 0x605   :  { %v836_v20 = vpop.permute.xlu1 %835 }
 0x606   :  { %v838_v26 = vsel %vm464_vm3, %v2060_v28, %v836_v20 }
 0x60c   :  { %v1608_v19 = vpop.eup %1607 }
 0x60d   :  { %v747_v21 = vmul.f32 %v1608_v19, %v1606_v15 }
 0x60f   :  { %1506 = vmatmul.mubr.msk.f32.vlgmr.msra.gmra.mrb[8].mxu1 %vm555_vm5, %v747_v21 }
 0x610   :  { %1509 = vmatpush3.xpose.msk.msra.mxu1 %vm478_vm4, %v838_v26  ;;  %1510 = vmatprep.mubr.msk.f32.mxu1 %vm1818_vm2, %v1816_v25 }
 0x611   :  { %1513 = vmatprep.subr.mxu1 %v1816_v25 }
 0x613   :  { %1511 = vmatmul.mubr.msk.f32.vlgmr.msra.gmra.mrb[10].mxu1 %vm478_vm4, %v832_v27 }
 0x614   :  { %1515 = vmatprep.mubr.msk.f32.mxu1 %vm1818_vm2, %v1816_v25 }
 0x6e2   :  { %v817_v29 = vpop.f32.mrb[8].mxu1 }
 0x6e3   :  { %v1507_v30 = vpop.f32.mrb[9].mxu1  ;;  %v822_v60 = vrot.slane %v817_v29, 4 }
 0x6e6   :  { %v917_v31 = vpop.f32.mrb[10].mxu1 }
 0x6e7   :  { %v1512_v32 = vpop.f32.mrb[11].mxu1  ;;  %v921_v33 = vsel %vm555_vm5, %v917_v31, -inf }
 0x6e8   :  { %922 = vmax.xlane.f32.xlu0 %v921_v33 }
 0x6fe   :  { %841 = vrot.lane.b32.xlu0 %v840_v35, %s1817_s27 }
 0x702   :  { %1012 = vrot.lane.b32.xlu0 %v2102_v8, %s1817_s27  ;;  %v1200_v8 = vld [vmem:[%s2227_s9] sm:$0xff] }
 0x775   :  { %v923_v36 = vpop.xlane.xlu0 %922 }
 0x776   :  { %v924_v37 = vsub.f32 %v917_v31, %v923_v36 }
 0x778   :  { %v925_v38 = vmul.f32 1.442695, %v924_v37 }
 0x779   :  { %v842_v39 = vpop.permute.xlu0 %841 }
 0x77a   :  { %1609 = vpow2.f32 %v925_v38  ;;  %v844_v40 = vsel %vm464_vm3, %v2065_v34, %v842_v39 }
 0x77b   :  { %1514 = vmatpush3.msra.mxu1 %v844_v40 }
 0x77c   :  { %1518 = vmatprep.subr.mxu1 %v1816_v25 }
 0x77d   :  { %v1013_v47 = vpop.permute.xlu0 %1012 }
 0x77e   :  { %v1015_v49 = vsel %vm464_vm3, %v828_v9, %v1013_v47  ;;  %v1201_v9 = vld [vmem:[%s2227_s9 + $0x8] sm:$0xff] }
 0x77f   :  { %v1575_v10 = vpack.c.bf16 %v1201_v9, %v1200_v8 }
 0x781   :  { %1577 = vmatprep.subr.msk.bf16.mxu0 %vm2016_vm1, %v1575_v10 }
 0x782   :  { %1580 = vmatpush3.bf16.xpose.msk.msra.mxu0 %vm2016_vm1, %v1575_v10 }
 0x784   :  { %v1610_v41 = vpop.eup %1609 }
 0x785   :  { %v927_v42 = vsel %vm555_vm5, %v1610_v41, 0.0 }
 0x786   :  { %928 = vadd.xlane.f32.xlu1 %v927_v42 }
 0x797   :  { %1017 = vrot.lane.b32.xlu1 %v2060_v28, %s1817_s27 }
 0x813   :  { %v929_v43 = vpop.xlane.xlu1 %928 }
 0x814   :  { %1611 = vrcp.f32 %v929_v43 }
 0x817   :  { %v1018_v45 = vpop.permute.xlu1 %1017 }
 0x818   :  { %v1020_v48 = vsel %vm464_vm3, %v834_v17, %v1018_v45 }
 0x81e   :  { %v1612_v44 = vpop.eup %1611 }
 0x81f   :  { %v931_v46 = vmul.f32 %v1612_v44, %v1610_v41 }
 0x821   :  { %1516 = vmatmul.mubr.msk.f32.vlgmr.msra.gmra.mrb[12].mxu1 %vm555_vm5, %v931_v46 }
 0x822   :  { %1519 = vmatpush3.xpose.msk.msra.mxu1 %vm478_vm4, %v1020_v48  ;;  %1520 = vmatprep.mubr.msk.f32.mxu1 %vm1818_vm2, %v1816_v25 }
 0x823   :  { %1523 = vmatprep.subr.mxu1 %v1816_v25 }
 0x825   :  { %1521 = vmatmul.mubr.msk.f32.vlgmr.msra.gmra.mrb[14].mxu1 %vm478_vm4, %v1015_v49 }
 0x826   :  { %1525 = vmatprep.mubr.msk.f32.mxu1 %vm1818_vm2, %v1816_v25 }
 0x8f4   :  { %v1001_v28 = vpop.f32.mrb[12].mxu1 }
 0x8f5   :  { %v1517_v50 = vpop.f32.mrb[13].mxu1  ;;  %v1006_v16 = vrot.slane %v1001_v28, 4 }
 0x8f6   :  { %v1413_v50 = vld [vmem:[%s2229_s11] ss:$0 sm:$0xff] }
 0x8f8   :  { %v1098_v51 = vpop.f32.mrb[14].mxu1 }
 0x8f9   :  { %v1522_v52 = vpop.f32.mrb[15].mxu1  ;;  %v1102_v53 = vsel %vm555_vm5, %v1098_v51, -inf }
 0x8fa   :  { %1103 = vmax.xlane.f32.xlu0 %v1102_v53 }
 0x910   :  { %1022 = vrot.lane.b32.xlu0 %v2065_v34, %s1817_s27 }
 0x987   :  { %v1104_v54 = vpop.xlane.xlu0 %1103 }
 0x988   :  { %v1105_v55 = vsub.f32 %v1098_v51, %v1104_v54  ;;  %v1414_v54 = vld [vmem:[%s2230_s12] ss:$0 sm:$0xff] }
 0x98a   :  { %v1106_v56 = vmul.f32 1.442695, %v1105_v55 }
 0x98b   :  { %v1023_v57 = vpop.permute.xlu0 %1022 }
 0x98c   :  { %1613 = vpow2.f32 %v1106_v56  ;;  %v1025_v58 = vsel %vm464_vm3, %v840_v35, %v1023_v57 }
 0x98d   :  { %1524 = vmatpush3.msra.mxu1 %v1025_v58 }
 0x996   :  { %v1614_v59 = vpop.eup %1613 }
 0x997   :  { %v1108_v25 = vsel %vm555_vm5, %v1614_v59, 0.0 }
 0x998   :  { %1109 = vadd.xlane.f32.xlu1 %v1108_v25 }
 0x9a9   :  { %823 = vrot.lane.b32.xlu1 %v822_v60, %s1819_s4 }
 0x9ad   :  { %642 = vrot.lane.b32.xlu1 %v641_v61, %s1819_s4 }
 0xa25   :  { %v1110_v34 = vpop.xlane.xlu1 %1109 }
 0xa26   :  { %1615 = vrcp.f32 %v1110_v34 }
 0xa29   :  { %v824_v62 = vpop.permute.xlu1 %823 }
 0xa2a   :  { %v826_v63 = vsel %vm478_vm4, %v817_v29, %v824_v62 }
 0xa2b   :  { %v1193_v1 = vrot.slane %v826_v63, 4 }
 0xa2d   :  { %v643_v2 = vpop.permute.xlu1 %642 }
 0xa2e   :  { %v645_v4 = vsel %vm478_vm4, %v2099_v3, %v643_v2  ;;  %v1202_v3 = vld [vmem:[%s2227_s9 + $0x10] sm:$0xff] }
 0xa2f   :  { %v1198_v5 = vsel %vm464_vm3, %v645_v4, %v1193_v1  ;;  %v1581_v12 = vpack.c.bf16 %v1203_v11, %v1202_v3 }
 0xa30   :  { %v1616_v6 = vpop.eup %1615  ;;  %1536 = vmatprep.mubr.msk.f32.mxu0 %vm155_vm0, %v1198_v5 }
 0xa31   :  { %v1112_v7 = vmul.f32 %v1616_v6, %v1614_v59  ;;  %1583 = vmatprep.subr.msk.bf16.mxu0 %vm2016_vm1, %v1581_v12 }
 0xa32   :  { %1586 = vmatpush3.bf16.xpose.msk.msra.mxu0 %vm2016_vm1, %v1581_v12 }
 0xa33   :  { %1526 = vmatmul.mubr.msk.f32.vlgmr.msra.gmra.mrb[16].mxu1 %vm555_vm5, %v1112_v7 }
 0xb06   :  { %v1182_v13 = vpop.f32.mrb[16].mxu1 }
 0xb07   :  { %v1187_v14 = vrot.slane %v1182_v13, 4  ;;  %v1527_v15 = vpop.f32.mrb[17].mxu1 }
 0xb09   :  { %1188 = vrot.lane.b32.xlu0 %v1187_v14, %s1819_s4 }
 0xb0d   :  { %1007 = vrot.lane.b32.xlu0 %v1006_v16, %s1819_s4 }
 0xb7b   :  { %v1189_v17 = vpop.permute.xlu0 %1188 }
 0xb7c   :  { %v1191_v18 = vsel %vm478_vm4, %v1182_v13, %v1189_v17 }
 0xb7d   :  { %v1196_v19 = vrot.slane %v1191_v18, 4 }
 0xb7f   :  { %v1008_v20 = vpop.permute.xlu0 %1007 }
 0xb80   :  { %v1010_v21 = vsel %vm478_vm4, %v1001_v28, %v1008_v20 }
 0xb81   :  { %v1199_v23 = vsel %vm464_vm3, %v1010_v21, %v1196_v19 }
 0xb82   :  { %1537 = vmatmul.mubr.msk.f32.vlgmr.msra.gmra.mrb[4].mxu0 %vm155_vm0, %v1199_v23 }
 0xc55   :  { %v1538_v26 = vpop.f32.mrb[4].mxu0 }
 0xc56   :  { %v1301_v27 = vadd.f32 %v1538_v26, %v1406_v0  ;;  %v1295_v29 = vpop.f32.mrb[5].mxu0 }
 0xc57   :  { %v1296_v30 = vadd.f32 %v1406_v0, %v1295_v29 }
 0xc58   :  { %v1305_v31 = vadd.f32 %v1301_v27, %v2052_v24 }
 0xc59   :  { %v1304_v32 = vadd.f32 %v1296_v30, %v2040_v22 }
 0xc5a   :  { %v1309_v33 = vsel %vm155_vm0, %v1305_v31, 0.0 }
 0xc5b   :  { %1310 = vadd.xlane.f32.xlu0 %v1309_v33  ;;  %v1306_v35 = vsel %vm155_vm0, %v1304_v32, 0.0 }
 0xc5c   :  { %1307 = vadd.xlane.f32.xlu1 %v1306_v35 }
 0xce8   :  { %v1311_v36 = vpop.xlane.xlu0 %1310 }
 0xce9   :  { %v1314_v37 = vmul.f32 0.03125, %v1311_v36  ;;  %v1308_v38 = vpop.xlane.xlu1 %1307 }
 0xcea   :  { %v1313_v39 = vmul.f32 0.03125, %v1308_v38 }
 0xceb   :  { %v1316_v40 = vsub.f32 %v1305_v31, %v1314_v37 }
 0xcec   :  { %v1315_v41 = vsub.f32 %v1304_v32, %v1313_v39 }
 0xced   :  { %v1318_v42 = vmul.f32 %v1316_v40, %v1316_v40 }
 0xcee   :  { %v1317_v43 = vmul.f32 %v1315_v41, %v1315_v41 }
 0xcef   :  { %v1322_v44 = vsel %vm155_vm0, %v1318_v42, 0.0 }
 0xcf0   :  { %1323 = vadd.xlane.f32.xlu1 %v1322_v44  ;;  %v1319_v24 = vsel %vm155_vm0, %v1317_v43, 0.0 }
 0xcf1   :  { %1320 = vadd.xlane.f32.xlu0 %v1319_v24 }
 0xd7d   :  { %v1324_v22 = vpop.xlane.xlu1 %1323 }
 0xd7e   :  { %v1326_v45 = vmul.f32 0.03125, %v1324_v22  ;;  %v1321_v46 = vpop.xlane.xlu0 %1320 }
 0xd7f   :  { %v1325_v47 = vmul.f32 0.03125, %v1321_v46 }
 0xd80   :  { %v1328_v48 = vadd.f32 1e-05, %v1326_v45 }
 0xd81   :  { %v1327_v49 = vadd.f32 1e-05, %v1325_v47 }
 0xd82   :  { %1617 = vrsqrt.f32 %v1328_v48 }
 0xd83   :  { %1619 = vrsqrt.f32 %v1327_v49 }
 0xd8c   :  { %v1618_v28 = vpop.eup %1617 }
 0xd8d   :  { %v1620_v51 = vpop.eup %1619  ;;  %v1332_v52 = vmul.f32 %v1618_v28, %v1316_v40 }
 0xd8e   :  { %v1331_v53 = vmul.f32 %v1620_v51, %v1315_v41 }
 0xd8f   :  { %v1341_v55 = vmul.f32 %v1413_v50, %v1332_v52 }
 0xd90   :  { %v1340_v56 = vmul.f32 %v1413_v50, %v1331_v53 }
 0xd91   :  { %v1350_v57 = vadd.f32 %v1414_v54, %v1341_v55 }
 0xd92   :  { %v1349_v58 = vadd.f32 %v1414_v54, %v1340_v56 }
 0xd93   :  { %1352 = vst.msk [vmem:[#allocation14 + $0x8] sm:$0xff] %vm155_vm0, %v1350_v57 }
 0xd94   :  { %1351 = vst.msk [vmem:[#allocation14] sm:$0xff] %vm155_vm0, %v1349_v58 }
 0xd95   :  { %1786 = shalt.err (!%p1783_p4)
}
 0xd96   :  { %s1787_s5 = scalar_lea.hbm %s2231_s13, 256 }
 0xd97   :  { %p1788_p5 = scmp.ne.s32.totalorder %s2231_s13, %s1787_s5  ;;  %p1791_p6 = scmp.lt.u32.totalorder %s1787_s5, %s2231_s13 }
 0xd99   :  { %p1793_p7 = pnand %p1791_p6, %p1788_p5 }
 0xd9b   :  { %1796 = shalt.err (!%p1793_p7)
}
 0xd9c   :  { %1364 = dma.vmem_to_hbm [thread:$0]  %s1359_s19, 256, %s2231_s13, [#allocation4], %s1809_s20, %s1809_s20, %s1810_s21  }
 0xd9d   :  { %1805 = dma.done.wait [#allocation4], 256  }
 0xd9e   :  { %1806 = vsyncadd [#allocation4], 4294967040 }
 0xd9f   :  { %1368 = vsyncpa [#allocation3], 1 }
 0xda0   :  { %1369 = vsyncpa [#allocation6], 1 }
 0xda1   :  { %1370 = vsyncpa [#allocation9], 1 }
 0xda2   :  { %1371 = vsyncpa [#allocation12], 1 }
 0xda3   :  { %1372 = vsyncpa [#allocation4], 1 }

</bundles_post_ra>
